<compile_context>
chip_gen: v7x
topology: tpu7x:2x2x1
jax: 0.10.0
libtpu: 0.0.40
codegen_flags: <defaults>
</compile_context>

<pallas_src>
import functools

import jax
import jax.numpy as jnp
from jax import lax
from jax.experimental import pallas as pl
from jax.experimental.pallas import tpu as pltpu

EPSILON = 1e-06
# TODO(synk): CLIP_DIV_PRED_MIN is referenced but not defined in the snippet; 1e-2 assumed.
CLIP_DIV_PRED_MIN = 1e-02

_LANES = 128
_MAX_TILE_ROWS = 2048      # (2048, 128) f32 tile = 1 MiB per stream
_NUM_CORE_SPLITS = 2       # leading "parallel" grid axis (v7x has 2 TensorCores)


def _mean_neuron_kernel_vec(scores_ref, subt_ref, div_ref, mask_ref,
                            sum_ref, cnt_ref, acc_ref, cacc_ref, *,
                            rows, tile_rows, tiles_per_core, need_row_mask,
                            clip_min):
    """Per-neuron subt/div path. Input tiles are (tile_rows, 128) lane-dense."""
    t = pl.program_id(1)

    @pl.when(t == 0)
    def _():
        acc_ref[...] = jnp.zeros_like(acc_ref)
        cacc_ref[...] = jnp.zeros_like(cacc_ref)

    mask = mask_ref[...]
    if need_row_mask:
        # Mask rows of partial / overshoot blocks (based on the *logical* block
        # index, so clamped-DMA re-reads contribute exactly zero).
        row_base = (pl.program_id(0) * tiles_per_core + t) * tile_rows
        row_ids = row_base + lax.broadcasted_iota(jnp.int32, (tile_rows, _LANES), 0)
        mask = jnp.logical_and(mask, row_ids < rows)

    div = jnp.maximum(div_ref[...], clip_min)                 # ObjectiveABC clip, fused
    normed = (scores_ref[...] - subt_ref[...]) / (div + EPSILON)

    # Per-tile fold into tiny (1,128) accumulators (single sublane reduce/tile).
    acc_ref[...] += jnp.sum(jnp.where(mask, normed, 0.0), axis=0, keepdims=True)
    cacc_ref[...] += jnp.sum(jnp.where(mask, 1, 0), axis=0,
                             keepdims=True).astype(jnp.int32)

    @pl.when(t == pl.num_programs(1) - 1)
    def _():
        sum_ref[...] = acc_ref[...]
        cnt_ref[...] = cacc_ref[...]


def _mean_neuron_kernel_scalar(params_ref, scores_ref, mask_ref,
                               sum_ref, cnt_ref, acc_ref, cacc_ref, *,
                               rows, tile_rows, tiles_per_core, need_row_mask):
    """Scalar subt/div path: params = [offset, scale] live in SMEM; only
    scores + bool mask stream from HBM."""
    t = pl.program_id(1)

    @pl.when(t == 0)
    def _():
        acc_ref[...] = jnp.zeros_like(acc_ref)
        cacc_ref[...] = jnp.zeros_like(cacc_ref)

    mask = mask_ref[...]
    if need_row_mask:
        row_base = (pl.program_id(0) * tiles_per_core + t) * tile_rows
        row_ids = row_base + lax.broadcasted_iota(jnp.int32, (tile_rows, _LANES), 0)
        mask = jnp.logical_and(mask, row_ids < rows)

    normed = (scores_ref[...] - params_ref[0]) * params_ref[1]

    acc_ref[...] += jnp.sum(jnp.where(mask, normed, 0.0), axis=0, keepdims=True)
    cacc_ref[...] += jnp.sum(jnp.where(mask, 1, 0), axis=0,
                             keepdims=True).astype(jnp.int32)

    @pl.when(t == pl.num_programs(1) - 1)
    def _():
        sum_ref[...] = acc_ref[...]
        cnt_ref[...] = cacc_ref[...]


def mean_neuron_forward(unit_scores, on_units_mask, subt_pred=None, div_pred=None,
                        clip_div_pred_min=CLIP_DIV_PRED_MIN):
    """JAX wrapper reproducing MeanNeuron.forward.

    unit_scores   : (N,)  float32
    on_units_mask : (N,)  bool
    subt_pred     : None, scalar, or (N,) float32   (None -> 0, module default)
    div_pred      : None, scalar, or (N,) float32   (None -> 1; provided values
                    are clipped to clip_div_pred_min, as in ObjectiveABC.__init__)
    returns 0-d float32 (NaN if the on-units selection is empty, like torch.mean)
    """
    scores = jnp.asarray(unit_scores, jnp.float32).reshape(-1)
    mask = jnp.asarray(on_units_mask, jnp.bool_).reshape(-1)
    n = scores.shape[0]

    subt = None if subt_pred is None else jnp.asarray(subt_pred, jnp.float32)
    div = None if div_pred is None else jnp.asarray(div_pred, jnp.float32)
    scalar_path = ((subt is None or subt.ndim == 0) and
                   (div is None or div.ndim == 0))

    # ---- layout: lane-dense (rows, 128); zero-copy reshape when N % 128 == 0 ----
    pad = (-n) % _LANES
    rows = (n + pad) // _LANES

    def _to_tiles(x):
        if pad:
            # Only the mask's pad value matters (False); other pads are masked out.
            x = jnp.pad(x, (0, pad))
        return x.reshape(rows, _LANES)

    scores2 = _to_tiles(scores)
    mask2 = _to_tiles(mask)

    # ---- tiling / grid ----------------------------------------------------------
    tile_rows = rows if rows <= _MAX_TILE_ROWS else _MAX_TILE_ROWS
    n_blocks = pl.cdiv(rows, tile_rows)
    cores = _NUM_CORE_SPLITS if n_blocks >= _NUM_CORE_SPLITS else 1
    tiles_per_core = pl.cdiv(n_blocks, cores)
    need_row_mask = (cores * tiles_per_core * tile_rows) != rows

    def tile_map(c, t):
        # Clamp so the DMA never starts past the array end; overshoot blocks are
        # neutralised by the in-kernel row mask (their logical rows >= rows).
        return (jnp.minimum(c * tiles_per_core + t, n_blocks - 1), 0)

    tile_spec = pl.BlockSpec((tile_rows, _LANES), tile_map)
    common = dict(rows=rows, tile_rows=tile_rows, tiles_per_core=tiles_per_core,
                  need_row_mask=need_row_mask)

    if scalar_path:
        offset = 0.0 if subt is None else subt
        if div is None:
            scale = 1.0 / (1.0 + EPSILON)                       # default: no clip
        else:
            scale = 1.0 / (jnp.maximum(div, clip_div_pred_min) + EPSILON)
        params = jnp.stack([jnp.asarray(offset, jnp.float32),
                            jnp.asarray(scale, jnp.float32)])
        kernel = functools.partial(_mean_neuron_kernel_scalar, **common)
        in_specs = [pl.BlockSpec(memory_space=pltpu.MemorySpace.SMEM),
                    tile_spec, tile_spec]
        inputs = (params, scores2, mask2)
    else:
        subt_v = (jnp.zeros((n,), jnp.float32) if subt is None
                  else jnp.broadcast_to(subt, (n,)).astype(jnp.float32))
        div_v = (jnp.ones((n,), jnp.float32) if div is None
                 else jnp.broadcast_to(div, (n,)).astype(jnp.float32))
        kernel = functools.partial(_mean_neuron_kernel_vec,
                                   clip_min=float(clip_div_pred_min), **common)
        in_specs = [tile_spec, tile_spec, tile_spec, tile_spec]
        inputs = (scores2, _to_tiles(subt_v), _to_tiles(div_v), mask2)

    # Lane-dense per-core partial outputs: core c owns lanes [c*128, (c+1)*128).
    out_map = lambda c, t: (0, c)
    sum_parts, cnt_parts = pl.pallas_call(
        kernel,
        out_shape=(jax.ShapeDtypeStruct((1, cores * _LANES), jnp.float32),
                   jax.ShapeDtypeStruct((1, cores * _LANES), jnp.int32)),
        grid=(cores, tiles_per_core),
        in_specs=in_specs,
        out_specs=(pl.BlockSpec((1, _LANES), out_map),
                   pl.BlockSpec((1, _LANES), out_map)),
        scratch_shapes=[pltpu.VMEM((1, _LANES), jnp.float32),
                        pltpu.VMEM((1, _LANES), jnp.int32)],
        compiler_params=pltpu.CompilerParams(
            dimension_semantics=("parallel", "arbitrary"),
            # Worst case pipelined footprint ~6.5 MiB (vec path, 2048-row tiles,
            # double buffered) -> fits all generations; 32 MiB gives headroom.
            vmem_limit_bytes=32 * 1024 * 1024),
    )(*inputs)

    # Tiny final combine (merges per-core partials on v7x and the 128 lanes).
    # count == 0  ->  0/0 = NaN, matching torch.mean over an empty selection.
    return jnp.sum(sum_parts) / jnp.sum(cnt_parts).astype(jnp.float32)


if __name__ == "__main__":
    key = jax.random.PRNGKey(0)
    k_scores, k_clust, k_subt, k_div, k_scores2, k_clust2 = jax.random.split(key, 6)

    num_clusters = 4
    on_clust_idx = 1
    # off_clust_idc = [0, 2, 3]  (disjoint from on_clust_idx; only the mask matters)

    # ---- Path 1: per-neuron subt/div, N % 128 == 0 (zero-copy lane-dense layout) ----
    num_neurons = 512
    clust_assignments = jax.random.randint(k_clust, (num_neurons,), 0, num_clusters)
    on_units_mask = clust_assignments == on_clust_idx
    unit_scores = jax.random.normal(k_scores, (num_neurons,), dtype=jnp.float32)
    subt_pred = jax.random.normal(k_subt, (num_neurons,), dtype=jnp.float32) * 0.1
    div_pred = jax.random.uniform(k_div, (num_neurons,), dtype=jnp.float32) + 0.5

    res_vec = jax.block_until_ready(
        mean_neuron_forward(unit_scores, on_units_mask, subt_pred, div_pred))
    div_clipped = jnp.maximum(div_pred, CLIP_DIV_PRED_MIN)   # ObjectiveABC clips at init
    ref_vec = jnp.mean(((unit_scores - subt_pred) / (div_clipped + EPSILON))[on_units_mask])
    assert jnp.allclose(res_vec, ref_vec, rtol=1e-5, atol=1e-6), (res_vec, ref_vec)

    # ---- Path 2: module defaults (subt=0, div=1), ragged N (pad + in-kernel masking) ----
    num_neurons2 = 300
    clust2 = jax.random.randint(k_clust2, (num_neurons2,), 0, num_clusters)
    on_units_mask2 = clust2 == on_clust_idx
    unit_scores2 = jax.random.normal(k_scores2, (num_neurons2,), dtype=jnp.float32)

    res_sc = jax.block_until_ready(mean_neuron_forward(unit_scores2, on_units_mask2))
    ref_sc = jnp.mean((unit_scores2 / (1.0 + EPSILON))[on_units_mask2])
    assert jnp.allclose(res_sc, ref_sc, rtol=1e-5, atol=1e-6), (res_sc, ref_sc)

    print("KERNEL_OK")
</pallas_src>

<mosaic_0001>
module attributes {stable_mosaic.version = 11 : i64} {
  func.func @_mean_neuron_kernel_vec(%arg0: i32, %arg1: i32, %arg2: memref<4x128xf32, #tpu.memory_space<vmem>>, %arg3: memref<4x128xf32, #tpu.memory_space<vmem>>, %arg4: memref<4x128xf32, #tpu.memory_space<vmem>>, %arg5: memref<4x128xi32, #tpu.memory_space<vmem>>, %arg6: memref<1x128xf32, #tpu.memory_space<vmem>>, %arg7: memref<1x128xi32, #tpu.memory_space<vmem>>, %arg8: memref<1x128xf32, #tpu.memory_space<vmem>>, %arg9: memref<1x128xi32, #tpu.memory_space<vmem>>) attributes {dimension_semantics = [#tpu.dimension_semantics<parallel>, #tpu.dimension_semantics<arbitrary>], iteration_bounds = array<i64: 1, 1>, scalar_prefetch = 0 : i64, scratch_operands = 2 : i64, tpu.core_type = #tpu.core_type<tc>, window_params = [{transform_indices = @transform_0, window_bounds = array<i64: 4, 128>}, {transform_indices = @transform_1, window_bounds = array<i64: 4, 128>}, {transform_indices = @transform_2, window_bounds = array<i64: 4, 128>}, {transform_indices = @transform_3, window_bounds = array<i64: 4, 128>}, {transform_indices = @transform_4, window_bounds = array<i64: 1, 128>}, {transform_indices = @transform_5, window_bounds = array<i64: 1, 128>}]} {
    %c0_i32 = arith.constant 0 : i32
    %0 = arith.cmpi eq, %arg1, %c0_i32 : i32
    %1 = arith.extui %0 : i1 to i32
    %c0_i32_0 = arith.constant 0 : i32
    %2 = arith.cmpi ne, %1, %c0_i32_0 : i32
    scf.if %2 {
      %cst_24 = arith.constant 0.000000e+00 : f32
      %32 = vector.broadcast %cst_24 : f32 to vector<1x128xf32>
      %c0_25 = arith.constant 0 : index
      %c0_26 = arith.constant 0 : index
      %33 = vector.load %arg8[%c0_25, %c0_26] : memref<1x128xf32, #tpu.memory_space<vmem>>, vector<1x128xf32>
      tpu.vector_store %arg8[%c0_25, %c0_26], %32 {strides = array<i32>} : memref<1x128xf32, #tpu.memory_space<vmem>>, vector<1x128xf32>,
      %c0_i32_27 = arith.constant 0 : i32
      %34 = vector.broadcast %c0_i32_27 : i32 to vector<1x128xi32>
      %c0_28 = arith.constant 0 : index
      %c0_29 = arith.constant 0 : index
      %35 = vector.load %arg9[%c0_28, %c0_29] : memref<1x128xi32, #tpu.memory_space<vmem>>, vector<1x128xi32>
      tpu.vector_store %arg9[%c0_28, %c0_29], %34 {strides = array<i32>} : memref<1x128xi32, #tpu.memory_space<vmem>>, vector<1x128xi32>,
    } else {
    }
    %c0 = arith.constant 0 : index
    %c0_1 = arith.constant 0 : index
    %3 = vector.load %arg5[%c0, %c0_1] : memref<4x128xi32, #tpu.memory_space<vmem>>, vector<4x128xi32>
    %cst = arith.constant dense<0> : vector<4x128xi32>
    %4 = arith.cmpi ne, %3, %cst : vector<4x128xi32>
    %c0_2 = arith.constant 0 : index
    %c0_3 = arith.constant 0 : index
    %5 = vector.load %arg4[%c0_2, %c0_3] : memref<4x128xf32, #tpu.memory_space<vmem>>, vector<4x128xf32>
    %cst_4 = arith.constant 0.00999999977 : f32
    %6 = vector.broadcast %cst_4 : f32 to vector<4x128xf32>
    %7 = arith.maximumf %5, %6 : vector<4x128xf32>
    %c0_5 = arith.constant 0 : index
    %c0_6 = arith.constant 0 : index
    %8 = vector.load %arg2[%c0_5, %c0_6] : memref<4x128xf32, #tpu.memory_space<vmem>>, vector<4x128xf32>
    %c0_7 = arith.constant 0 : index
    %c0_8 = arith.constant 0 : index
    %9 = vector.load %arg3[%c0_7, %c0_8] : memref<4x128xf32, #tpu.memory_space<vmem>>, vector<4x128xf32>
    %10 = arith.subf %8, %9 : vector<4x128xf32>
    %cst_9 = arith.constant 9.99999997E-7 : f32
    %11 = vector.broadcast %cst_9 : f32 to vector<4x128xf32>
    %12 = arith.addf %7, %11 : vector<4x128xf32>
    %13 = arith.divf %10, %12 : vector<4x128xf32>
    %c0_10 = arith.constant 0 : index
    %c0_11 = arith.constant 0 : index
    %14 = vector.load %arg8[%c0_10, %c0_11] : memref<1x128xf32, #tpu.memory_space<vmem>>, vector<1x128xf32>
    %cst_12 = arith.constant 0.000000e+00 : f32
    %15 = vector.broadcast %cst_12 : f32 to vector<4x128xf32>
    %16 = arith.select %4, %13, %15 : vector<4x128xi1>, vector<4x128xf32>
    %cst_13 = arith.constant dense<0.000000e+00> : vector<128xf32>
    %17 = vector.multi_reduction <add>, %16, %cst_13 [0] : vector<4x128xf32> to vector<128xf32>
    %18 = vector.shape_cast %17 : vector<128xf32> to vector<1x128xf32>
    %19 = arith.addf %14, %18 : vector<1x128xf32>
    %c0_14 = arith.constant 0 : index
    %c0_15 = arith.constant 0 : index
    %20 = vector.load %arg8[%c0_14, %c0_15] : memref<1x128xf32, #tpu.memory_space<vmem>>, vector<1x128xf32>
    tpu.vector_store %arg8[%c0_14, %c0_15], %19 {strides = array<i32>} : memref<1x128xf32, #tpu.memory_space<vmem>>, vector<1x128xf32>,
    %c0_16 = arith.constant 0 : index
    %c0_17 = arith.constant 0 : index
    %21 = vector.load %arg9[%c0_16, %c0_17] : memref<1x128xi32, #tpu.memory_space<vmem>>, vector<1x128xi32>
    %c1_i32 = arith.constant 1 : i32
    %c0_i32_18 = arith.constant 0 : i32
    %22 = vector.broadcast %c1_i32 : i32 to vector<4x128xi32>
    %23 = vector.broadcast %c0_i32_18 : i32 to vector<4x128xi32>
    %24 = arith.select %4, %22, %23 : vector<4x128xi1>, vector<4x128xi32>
    %cst_19 = arith.constant dense<0> : vector<128xi32>
    %25 = vector.multi_reduction <add>, %24, %cst_19 [0] : vector<4x128xi32> to vector<128xi32>
    %26 = vector.shape_cast %25 : vector<128xi32> to vector<1x128xi32>
    %27 = arith.addi %21, %26 : vector<1x128xi32>
    %c0_20 = arith.constant 0 : index
    %c0_21 = arith.constant 0 : index
    %28 = vector.load %arg9[%c0_20, %c0_21] : memref<1x128xi32, #tpu.memory_space<vmem>>, vector<1x128xi32>
    tpu.vector_store %arg9[%c0_20, %c0_21], %27 {strides = array<i32>} : memref<1x128xi32, #tpu.memory_space<vmem>>, vector<1x128xi32>,
    %c0_i32_22 = arith.constant 0 : i32
    %29 = arith.cmpi eq, %arg1, %c0_i32_22 : i32
    %30 = arith.extui %29 : i1 to i32
    %c0_i32_23 = arith.constant 0 : i32
    %31 = arith.cmpi ne, %30, %c0_i32_23 : i32
    scf.if %31 {
      %c0_24 = arith.constant 0 : index
      %c0_25 = arith.constant 0 : index
      %32 = vector.load %arg8[%c0_24, %c0_25] : memref<1x128xf32, #tpu.memory_space<vmem>>, vector<1x128xf32>
      %c0_26 = arith.constant 0 : index
      %c0_27 = arith.constant 0 : index
      %33 = vector.load %arg6[%c0_26, %c0_27] : memref<1x128xf32, #tpu.memory_space<vmem>>, vector<1x128xf32>
      tpu.vector_store %arg6[%c0_26, %c0_27], %32 {strides = array<i32>} : memref<1x128xf32, #tpu.memory_space<vmem>>, vector<1x128xf32>,
      %c0_28 = arith.constant 0 : index
      %c0_29 = arith.constant 0 : index
      %34 = vector.load %arg9[%c0_28, %c0_29] : memref<1x128xi32, #tpu.memory_space<vmem>>, vector<1x128xi32>
      %c0_30 = arith.constant 0 : index
      %c0_31 = arith.constant 0 : index
      %35 = vector.load %arg7[%c0_30, %c0_31] : memref<1x128xi32, #tpu.memory_space<vmem>>, vector<1x128xi32>
      tpu.vector_store %arg7[%c0_30, %c0_31], %34 {strides = array<i32>} : memref<1x128xi32, #tpu.memory_space<vmem>>, vector<1x128xi32>,
    } else {
    }
    return
  }
  func.func @transform_0(%arg0: i32, %arg1: i32) -> (i32, i32) {
    %c1_i32 = arith.constant 1 : i32
    %0 = arith.muli %arg0, %c1_i32 : i32
    %1 = arith.addi %0, %arg1 : i32
    %c0_i32 = arith.constant 0 : i32
    %2 = arith.minsi %1, %c0_i32 : i32
    %c0_i32_0 = arith.constant 0 : i32
    %c0_i32_1 = arith.constant 0 : i32
    return %2, %c0_i32_0 : i32, i32
  }
  func.func @transform_1(%arg0: i32, %arg1: i32) -> (i32, i32) {
    %c1_i32 = arith.constant 1 : i32
    %0 = arith.muli %arg0, %c1_i32 : i32
    %1 = arith.addi %0, %arg1 : i32
    %c0_i32 = arith.constant 0 : i32
    %2 = arith.minsi %1, %c0_i32 : i32
    %c0_i32_0 = arith.constant 0 : i32
    %c0_i32_1 = arith.constant 0 : i32
    return %2, %c0_i32_0 : i32, i32
  }
  func.func @transform_2(%arg0: i32, %arg1: i32) -> (i32, i32) {
    %c1_i32 = arith.constant 1 : i32
    %0 = arith.muli %arg0, %c1_i32 : i32
    %1 = arith.addi %0, %arg1 : i32
    %c0_i32 = arith.constant 0 : i32
    %2 = arith.minsi %1, %c0_i32 : i32
    %c0_i32_0 = arith.constant 0 : i32
    %c0_i32_1 = arith.constant 0 : i32
    return %2, %c0_i32_0 : i32, i32
  }
  func.func @transform_3(%arg0: i32, %arg1: i32) -> (i32, i32) {
    %c1_i32 = arith.constant 1 : i32
    %0 = arith.muli %arg0, %c1_i32 : i32
    %1 = arith.addi %0, %arg1 : i32
    %c0_i32 = arith.constant 0 : i32
    %2 = arith.minsi %1, %c0_i32 : i32
    %c0_i32_0 = arith.constant 0 : i32
    %c0_i32_1 = arith.constant 0 : i32
    return %2, %c0_i32_0 : i32, i32
  }
  func.func @transform_4(%arg0: i32, %arg1: i32) -> (i32, i32) {
    %c0_i32 = arith.constant 0 : i32
    %c0_i32_0 = arith.constant 0 : i32
    return %c0_i32, %arg0 : i32, i32
  }
  func.func @transform_5(%arg0: i32, %arg1: i32) -> (i32, i32) {
    %c0_i32 = arith.constant 0 : i32
    %c0_i32_0 = arith.constant 0 : i32
    return %c0_i32, %arg0 : i32, i32
  }
}

</mosaic_0001>

<bundles_post_ra>
// kernel: tpu_custom_call.1
= control target key start
LH: loop header
LB: loop body
LE: loop exit
PB: predicated region body
PF: predicated region fallthrough
CT: control target
= control target key end

     0   :  { %11 = vsyncpa [#allocation5], 0  ;;  %v281_v2 = vmov 0.0   ;;  %v282_v3 = vmov 0   ;;  %vm147_vm1 = vcmask 1043456   ;;  %s355_s0 = inlined_call_operand.vmem [shape: f32[4,128], index: 0, kind: input, shape index: {}]   ;;  %s356_s1 = inlined_call_operand.vmem [shape: f32[4,128], index: 1, kind: input, shape index: {}]   ;;  %s357_s2 = inlined_call_operand.vmem [shape: f32[4,128], index: 2, kind: input, shape index: {}]   ;;  %s358_s3 = inlined_call_operand.vmem [shape: s32[4,128], index: 3, kind: input, shape index: {}]   ;;  %s359_s4 = inlined_call_operand.hbm [shape: f32[1,128], index: 4, kind: output, shape index: {0}]   ;;  %s360_s5 = inlined_call_operand.hbm [shape: s32[1,128], index: 5, kind: output, shape index: {1}]  }
   0x1   :  { %v135_v0 = vld [vmem:[%s358_s3] sm:$0xf]  ;;  %133 = vst [vmem:[#allocation2] sm:$0x1] %v281_v2  ;;  %134 = vst [vmem:[#allocation3] sm:$0x1] %v282_v3 }
   0x2   :  { %v137_v1 = vld [vmem:[%s357_s2] sm:$0xf]  ;;  %vm136_vm0 = vcmp.ne.s32.totalorder %v135_v0, 0 }
   0x3   :  { %v138_v4 = vmax.f32 %v137_v1, 0.01  ;;  %v158_v5 = vsel %vm136_vm0, 1, %v282_v3 }
   0x4   :  { %12 = vsyncpa [#allocation7], 0  ;;  %v159_v7 = vsel %vm147_vm1, %v158_v5, 0  ;;  %v139_v11 = vld [vmem:[%s355_s0] sm:$0xf]  ;;  %s283_s24 = smov [#allocation6]  }
   0x5   :  { %v142_v6 = vadd.f32 1e-06, %v138_v4  ;;  %v160_v8 = vrot.slane %v159_v7, 4  ;;  %v140_v12 = vld [vmem:[%s356_s1] sm:$0xf]  ;;  %s191_s0 = sshll.u32 %s283_s24, 4  ;;  %s192_s0 = int_to_ptr.vmem [resolvable:$true] %s191_s0 }
   0x6   :  { %v141_v14 = vsub.f32 %v139_v11, %v140_v12  ;;  %s233_s1 = scalar_lea.vmem %s192_s0, 16  ;;  %s237_s25 = scalar_lea.vmem %s192_s0, 32 }
   0x7   :  { %231 = vrcp.f32 %v142_v6  ;;  %v161_v9 = vadd.s32 %v160_v8, %v159_v7  ;;  %p234_p0 = scmp.ne.s32.totalorder %s192_s0, %s233_s1  ;;  %p238_p1 = scmp.lt.s32.totalorder %s192_s0, %s192_s0 }
   0x8   :  { %v157_v16 = vld [vmem:[#allocation3] sm:$0x1]  ;;  %p239_p2 = scmp.lt.s32.totalorder %s237_s25, %s233_s1 }
   0x9   :  { %v162_v10 = vrot.slane %v161_v9, 2 }
   0xa   :  { %p240_p3 = por %p239_p2, %p238_p1 }
   0xb   :  { %v163_v13 = vadd.s32 %v162_v10, %v161_v9 }
   0xc   :  { %p241_p4 = pnand %p240_p3, %p234_p0 }
   0xd   :  { %v164_v15 = vrot.slane %v163_v13, 1 }
   0xf   :  { %v165_v17 = vadd.s32 %v164_v15, %v163_v13 }
  0x11   :  { %v232_v18 = vpop.eup %231  ;;  %v166_v20 = vadd.s32 %v165_v17, %v157_v16 }
  0x12   :  { %v144_v19 = vmul.f32 %v232_v18, %v141_v14 }
  0x13   :  { %167 = vst [vmem:[#allocation3] sm:$0x1] %v166_v20 }
  0x14   :  { %v146_v21 = vsel %vm136_vm0, %v144_v19, 0.0 }
  0x15   :  { %v148_v22 = vsel %vm147_vm1, %v146_v21, 0.0 }
  0x16   :  { %v149_v23 = vrot.slane %v148_v22, 4 }
  0x18   :  { %v150_v24 = vadd.f32 %v149_v23, %v148_v22 }
  0x1a   :  { %v151_v25 = vrot.slane %v150_v24, 2  ;;  %v173_v26 = vld [vmem:[#allocation3] sm:$0x1] }
  0x1b   :  { %174 = vst [vmem:[#allocation6] sm:$0x1] %v173_v26 }
  0x1c   :  { %v152_v27 = vadd.f32 %v151_v25, %v150_v24 }
  0x1d   :  { %244 = shalt.err (!%p241_p4)
}
  0x1e   :  { %s245_s28 = scalar_lea.hbm %s360_s5, 16 }
  0x1f   :  { %p246_p5 = scmp.ne.s32.totalorder %s360_s5, %s245_s28  ;;  %p249_p6 = scmp.lt.u32.totalorder %s245_s28, %s360_s5 }
  0x21   :  { %p251_p7 = pnand %p249_p6, %p246_p5 }
  0x23   :  { %254 = shalt.err (!%p251_p7)
}
  0x24   :  { %194 = dma.vmem_to_hbm [thread:$0]  %s192_s0, 16, %s360_s5, [#allocation7]   ;;  %v153_v28 = vrot.slane %v152_v27, 1  ;;  %v145_v29 = vld [vmem:[#allocation2] sm:$0x1] }
  0x25   :  { %s284_s10 = smov [#allocation4]  }
  0x26   :  { %v154_v30 = vadd.f32 %v153_v28, %v152_v27  ;;  %s181_s11 = sshll.u32 %s284_s10, 4  ;;  %s182_s11 = int_to_ptr.vmem [resolvable:$true] %s181_s11 }
  0x27   :  { %s255_s12 = scalar_lea.vmem %s182_s11, 16  ;;  %s259_s13 = scalar_lea.vmem %s182_s11, 32 }
  0x28   :  { %v155_v31 = vadd.f32 %v154_v30, %v145_v29  ;;  %p256_p8 = scmp.ne.s32.totalorder %s182_s11, %s255_s12  ;;  %p260_p9 = scmp.lt.s32.totalorder %s182_s11, %s182_s11 }
  0x29   :  { %p261_p10 = scmp.lt.s32.totalorder %s259_s13, %s255_s12 }
  0x2a   :  { %156 = vst [vmem:[#allocation2] sm:$0x1] %v155_v31 }
  0x2b   :  { %p262_p11 = por %p261_p10, %p260_p9 }
  0x2d   :  { %p263_p12 = pnand %p262_p11, %p256_p8 }
  0x31   :  { %v171_v32 = vld [vmem:[#allocation2] sm:$0x1] }
  0x32   :  { %172 = vst [vmem:[#allocation4] sm:$0x1] %v171_v32 }
  0x33   :  { %266 = shalt.err (!%p263_p12)
}
  0x34   :  { %s267_s15 = scalar_lea.hbm %s359_s4, 16 }
  0x35   :  { %p268_p13 = scmp.ne.s32.totalorder %s359_s4, %s267_s15  ;;  %p271_p0 = scmp.lt.u32.totalorder %s267_s15, %s359_s4 }
  0x37   :  { %p273_p1 = pnand %p271_p0, %p268_p13 }
  0x39   :  { %276 = shalt.err (!%p273_p1)
}
  0x3a   :  { %184 = dma.vmem_to_hbm [thread:$0]  %s182_s11, 16, %s359_s4, [#allocation5]  }
  0x3b   :  { %277 = dma.done.wait [#allocation5], 16  }
  0x3c   :  { %278 = vsyncadd [#allocation5], 4294967280 }
  0x3d   :  { %279 = dma.done.wait [#allocation7], 16  }
  0x3e   :  { %280 = vsyncadd [#allocation7], 4294967280 }
  0x3f   :  { %201 = vsyncpa [#allocation5], 1 }
  0x40   :  { %202 = vsyncpa [#allocation7], 1 }

</bundles_post_ra>
